<compile_context>
chip_gen: v7x
topology: tpu7x:2x2x1
jax: 0.10.0
libtpu: 0.0.40
codegen_flags: <defaults>
</compile_context>

<pallas_src>
import functools
import math

import jax
import jax.numpy as jnp
from jax.experimental import pallas as pl
from jax.experimental.pallas import tpu as pltpu

LOG_STD_MAX = 2.0
LOG_STD_MIN = -20.0

_LANE = 128     # f32 lane width
_SUBLANE = 8    # f32 sublane count
_VMEM_CAP_BYTES = 48 * 1024 * 1024     # stay well under v7x's 64 MiB physical VMEM
_VMEM_FLOOR_BYTES = 16 * 1024 * 1024   # generous floor for Mosaic internal scratch


def _round_up(x, m):
    return ((x + m - 1) // m) * m


def _tile_vmem_bytes(rows, cols, dtype):
    """VMEM footprint of a (rows, cols) tile after lane/sublane padding."""
    itemsize = jnp.dtype(dtype).itemsize
    sublane = _SUBLANE * max(1, 4 // itemsize)
    return _round_up(max(rows, 1), sublane) * _round_up(max(cols, 1), _LANE) * itemsize


def _gaussian_policy_kernel(max_action, matmul_dtype,
                            c_ref,                       # SMEM (1,1): log-prob constant
                            obs_ref, eps_ref,            # (TB, S), (TB, A) batch tiles
                            w1_ref, b1_ref, w2_ref, b2_ref, w3_ref, b3_ref,
                            std_ref,                     # (1, A)
                            act_ref, lp_ref):            # (TB, A), (TB, 1)
    # --- MLP: Linear -> ReLU -> Linear -> ReLU -> Linear -> Tanh ---
    # Weights arrive pre-cast to matmul_dtype (done once in prepare_params).
    x = obs_ref[...].astype(matmul_dtype)
    h1 = jnp.dot(x, w1_ref[...], preferred_element_type=jnp.float32) + b1_ref[...]
    h1 = jnp.maximum(h1, 0.0)
    h2 = jnp.dot(h1.astype(matmul_dtype), w2_ref[...],
                 preferred_element_type=jnp.float32) + b2_ref[...]
    h2 = jnp.maximum(h2, 0.0)
    mean = jnp.tanh(jnp.dot(h2.astype(matmul_dtype), w3_ref[...],
                            preferred_element_type=jnp.float32) + b3_ref[...])

    # --- rsample: actions = mean + std * eps  (std = exp(clip(log_std)), hoisted) ---
    eps = eps_ref[...]
    act_ref[...] = max_action * (mean + std_ref[...] * eps)

    # --- log_prob summed over action dim, with z = eps exactly:
    #       sum_a(-0.5*eps^2 - log_std - 0.5*log(2*pi)) = -0.5*sum(eps^2) + C
    lp_ref[...] = -0.5 * jnp.sum(eps * eps, axis=-1, keepdims=True) + c_ref[0, 0]


def prepare_params(params, *, matmul_dtype=jnp.float32):
    """One-time parameter prep, hoisted out of the per-step forward.

    Pre-casts weights to matmul_dtype (use jnp.bfloat16 on v5e/v6e/v7x for the
    bf16-native MXU), precomputes std = exp(clip(log_std)) and the
    batch-independent log-prob constant C.
    """
    log_std = jnp.clip(params["log_std"].astype(jnp.float32), LOG_STD_MIN, LOG_STD_MAX)
    act_dim = log_std.shape[-1]
    c = jnp.sum(-log_std) - 0.5 * act_dim * math.log(2.0 * math.pi)
    return {
        "w1": jnp.asarray(params["w1"], matmul_dtype),
        "b1": jnp.asarray(params["b1"], jnp.float32),
        "w2": jnp.asarray(params["w2"], matmul_dtype),
        "b2": jnp.asarray(params["b2"], jnp.float32),
        "w3": jnp.asarray(params["w3"], matmul_dtype),
        "b3": jnp.asarray(params["b3"], jnp.float32),
        "std": jnp.exp(log_std),                            # [1, A]
        "c": jnp.reshape(c, (1, 1)).astype(jnp.float32),    # [1, 1] SMEM scalar
    }


def gaussian_policy_forward(obs, prepared, eps, max_action, *, batch_tile=2048):
    """Full GaussianPolicy.forward (rsample + log_prob) in one Pallas call."""
    obs = jnp.asarray(obs, jnp.float32)
    eps = jnp.asarray(eps, jnp.float32)
    B, S = obs.shape
    H = prepared["w1"].shape[1]
    A = prepared["w3"].shape[1]
    matmul_dtype = prepared["w1"].dtype

    # Batch tile: as large as the VMEM budget allows, no padding anywhere.
    TB = _round_up(min(batch_tile, B), _SUBLANE)
    # Prefer >= 2 tiles when the batch is big enough so both v7x TensorCores
    # get work (harmless on single-TC v5e/v6e).
    if pl.cdiv(B, TB) < 2 and B > 2 * _SUBLANE:
        TB = _round_up(pl.cdiv(B, 2), _SUBLANE)

    def vmem_budget(tb):
        resident = (_tile_vmem_bytes(S, H, matmul_dtype)
                    + _tile_vmem_bytes(H, H, matmul_dtype)
                    + _tile_vmem_bytes(H, A, matmul_dtype)
                    + 2 * _tile_vmem_bytes(1, H, jnp.float32)
                    + 2 * _tile_vmem_bytes(1, A, jnp.float32))
        streamed = (_tile_vmem_bytes(tb, S, jnp.float32)
                    + 2 * _tile_vmem_bytes(tb, A, jnp.float32)
                    + _tile_vmem_bytes(tb, 1, jnp.float32))
        interm = 3 * _tile_vmem_bytes(tb, max(S, H, A), jnp.float32)  # h1/h2/mean spill
        return 2 * (resident + streamed) + interm   # double-buffered + scratch

    while TB > _SUBLANE and vmem_budget(TB) > _VMEM_CAP_BYTES:
        TB = _round_up(TB // 2, _SUBLANE)
    nb = pl.cdiv(B, TB)
    vmem_limit = int(min(_VMEM_CAP_BYTES, max(_VMEM_FLOOR_BYTES, vmem_budget(TB))))

    kernel = functools.partial(_gaussian_policy_kernel, float(max_action), matmul_dtype)

    def batched(d):
        return pl.BlockSpec((TB, d), lambda i: (i, 0))

    def resident(r, d):
        return pl.BlockSpec((r, d), lambda i: (0, 0))

    w_bytes = jnp.dtype(matmul_dtype).itemsize
    cost = pl.CostEstimate(
        flops=2 * B * (S * H + H * H + H * A),
        transcendentals=B * A,                                     # tanh
        bytes_accessed=(4 * (B * S + 2 * B * A + B)                # obs, eps, actions, lp
                        + w_bytes * (S * H + H * H + H * A)        # weights
                        + 4 * (2 * H + 2 * A)),                    # biases + std
    )

    actions, lp = pl.pallas_call(
        kernel,
        grid=(nb,),
        in_specs=[
            pl.BlockSpec(memory_space=pltpu.MemorySpace.SMEM),  # c (scalar)
            batched(S),            # obs tile (true width, no lane padding)
            batched(A),            # eps tile
            resident(S, H),        # w1 (pre-cast, VMEM-resident across grid steps)
            resident(1, H),        # b1
            resident(H, H),        # w2
            resident(1, H),        # b2
            resident(H, A),        # w3
            resident(1, A),        # b3
            resident(1, A),        # std
        ],
        out_specs=(
            pl.BlockSpec((TB, A), lambda i: (i, 0)),
            pl.BlockSpec((TB, 1), lambda i: (i, 0)),
        ),
        out_shape=(
            jax.ShapeDtypeStruct((B, A), jnp.float32),
            jax.ShapeDtypeStruct((B, 1), jnp.float32),
        ),
        compiler_params=pltpu.CompilerParams(
            dimension_semantics=("parallel",),   # batch tiles shard across TCs (v7x)
            vmem_limit_bytes=vmem_limit,
        ),
        cost_estimate=cost,
    )(prepared["c"], obs, eps,
      prepared["w1"], prepared["b1"], prepared["w2"], prepared["b2"],
      prepared["w3"], prepared["b3"], prepared["std"])

    return actions, lp[:, 0]


def _orthogonal(key, out_dim, in_dim, gain=1.0):
    # matches nn.init.orthogonal_ on a (out_dim, in_dim) weight, then transpose
    w = jax.nn.initializers.orthogonal(scale=gain)(key, (out_dim, in_dim), jnp.float32)
    return w.T  # -> [in_dim, out_dim] for x @ W


def init_params(key, state_dim, hidden_dim, act_dim):
    k1, k2, k3 = jax.random.split(key, 3)
    return {
        "w1": _orthogonal(k1, hidden_dim, state_dim),
        "b1": jnp.zeros((1, hidden_dim), jnp.float32),
        "w2": _orthogonal(k2, hidden_dim, hidden_dim),
        "b2": jnp.zeros((1, hidden_dim), jnp.float32),
        "w3": _orthogonal(k3, act_dim, hidden_dim),
        "b3": jnp.zeros((1, act_dim), jnp.float32),
        "log_std": jnp.zeros((1, act_dim), jnp.float32),  # nn.Parameter(torch.zeros(act_dim))
    }


if __name__ == "__main__":
    # Small, deliberately non-aligned shapes to exercise ragged tiles / true widths.
    B, state_dim, hidden_dim, act_dim = 6, 12, 32, 5
    max_action = 2.5

    root = jax.random.PRNGKey(0)
    k_params, k_obs, k_eps = jax.random.split(root, 3)

    params = init_params(k_params, state_dim, hidden_dim, act_dim)
    # One-time prep (use matmul_dtype=jnp.bfloat16 for the bf16-native MXU path).
    prepared = prepare_params(params, matmul_dtype=jnp.float32)

    obs = jax.random.normal(k_obs, (B, state_dim), jnp.float32)
    eps = jax.random.normal(k_eps, (B, act_dim), jnp.float32)  # rsample noise

    actions, log_probs = gaussian_policy_forward(obs, prepared, eps, max_action)
    jax.block_until_ready((actions, log_probs))

    # --- reference in plain JAX (same forward semantics as the PyTorch module) ---
    h1 = jnp.maximum(obs @ params["w1"] + params["b1"], 0.0)
    h2 = jnp.maximum(h1 @ params["w2"] + params["b2"], 0.0)
    mean = jnp.tanh(h2 @ params["w3"] + params["b3"])
    log_std = jnp.clip(params["log_std"], LOG_STD_MIN, LOG_STD_MAX)
    std = jnp.exp(log_std)
    act_ref = max_action * (mean + std * eps)
    lp_ref = jnp.sum(-0.5 * eps * eps - log_std - 0.5 * math.log(2.0 * math.pi), axis=-1)

    assert actions.shape == (B, act_dim) and log_probs.shape == (B,)
    if jnp.dtype(prepared["w1"].dtype) == jnp.dtype(jnp.float32):  # bf16 path not bit-comparable
        assert jnp.allclose(actions, act_ref, atol=1e-4, rtol=1e-4)
        assert jnp.allclose(log_probs, lp_ref, atol=1e-4, rtol=1e-4)

    # TODO(synk): act()/reset_std() host-side utilities and the tanh-squash Jacobian
    # (not used in GaussianPolicy.forward) are intentionally not ported.
    print("KERNEL_OK")
</pallas_src>

<mosaic_0001>
module attributes {stable_mosaic.version = 11 : i64} {
  func.func @_gaussian_policy_kernel(%arg0: i32, %arg1: memref<1x1xf32, #tpu.memory_space<smem>>, %arg2: memref<8x12xf32, #tpu.memory_space<vmem>>, %arg3: memref<8x5xf32, #tpu.memory_space<vmem>>, %arg4: memref<12x32xf32, #tpu.memory_space<vmem>>, %arg5: memref<1x32xf32, #tpu.memory_space<vmem>>, %arg6: memref<32x32xf32, #tpu.memory_space<vmem>>, %arg7: memref<1x32xf32, #tpu.memory_space<vmem>>, %arg8: memref<32x5xf32, #tpu.memory_space<vmem>>, %arg9: memref<1x5xf32, #tpu.memory_space<vmem>>, %arg10: memref<1x5xf32, #tpu.memory_space<vmem>>, %arg11: memref<8x5xf32, #tpu.memory_space<vmem>>, %arg12: memref<8x1xf32, #tpu.memory_space<vmem>>) attributes {dimension_semantics = [#tpu.dimension_semantics<parallel>], iteration_bounds = array<i64: 1>, scalar_prefetch = 0 : i64, scratch_operands = 0 : i64, tpu.core_type = #tpu.core_type<tc>, window_params = [{transform_indices = @transform_0, window_bounds = array<i64: 1, 1>}, {transform_indices = @transform_1, window_bounds = array<i64: 8, 12>}, {transform_indices = @transform_2, window_bounds = array<i64: 8, 5>}, {pipeline_mode = #tpu.pipeline_mode<synchronous>, transform_indices = @transform_3, window_bounds = array<i64: 12, 32>}, {pipeline_mode = #tpu.pipeline_mode<synchronous>, transform_indices = @transform_4, window_bounds = array<i64: 1, 32>}, {pipeline_mode = #tpu.pipeline_mode<synchronous>, transform_indices = @transform_5, window_bounds = array<i64: 32, 32>}, {pipeline_mode = #tpu.pipeline_mode<synchronous>, transform_indices = @transform_6, window_bounds = array<i64: 1, 32>}, {pipeline_mode = #tpu.pipeline_mode<synchronous>, transform_indices = @transform_7, window_bounds = array<i64: 32, 5>}, {pipeline_mode = #tpu.pipeline_mode<synchronous>, transform_indices = @transform_8, window_bounds = array<i64: 1, 5>}, {pipeline_mode = #tpu.pipeline_mode<synchronous>, transform_indices = @transform_9, window_bounds = array<i64: 1, 5>}, {transform_indices = @transform_10, window_bounds = array<i64: 8, 5>}, {transform_indices = @transform_11, window_bounds = array<i64: 8, 1>}]} {
    %c0 = arith.constant 0 : index
    %c0_0 = arith.constant 0 : index
    %0 = vector.load %arg2[%c0, %c0_0] : memref<8x12xf32, #tpu.memory_space<vmem>>, vector<8x12xf32>
    %c0_1 = arith.constant 0 : index
    %c0_2 = arith.constant 0 : index
    %1 = vector.load %arg4[%c0_1, %c0_2] : memref<12x32xf32, #tpu.memory_space<vmem>>, vector<12x32xf32>
    %cst = arith.constant dense<0.000000e+00> : vector<8x32xf32>
    %2 = tpu.matmul %0, %1, %cst {dimension_numbers = #tpu.dot_dimension_numbers<[1], [0], [0], [1], [0, 0, 1, 1], [], []>} : vector<8x12xf32>, vector<12x32xf32>, vector<8x32xf32> -> vector<8x32xf32>
    %c0_3 = arith.constant 0 : index
    %c0_4 = arith.constant 0 : index
    %3 = vector.load %arg5[%c0_3, %c0_4] : memref<1x32xf32, #tpu.memory_space<vmem>>, vector<1x32xf32>
    %4 = vector.broadcast %3 : vector<1x32xf32> to vector<8x32xf32>
    %5 = arith.addf %2, %4 : vector<8x32xf32>
    %cst_5 = arith.constant 0.000000e+00 : f32
    %6 = vector.broadcast %cst_5 : f32 to vector<8x32xf32>
    %7 = arith.maximumf %5, %6 : vector<8x32xf32>
    %c0_6 = arith.constant 0 : index
    %c0_7 = arith.constant 0 : index
    %8 = vector.load %arg6[%c0_6, %c0_7] : memref<32x32xf32, #tpu.memory_space<vmem>>, vector<32x32xf32>
    %cst_8 = arith.constant dense<0.000000e+00> : vector<8x32xf32>
    %9 = tpu.matmul %7, %8, %cst_8 {dimension_numbers = #tpu.dot_dimension_numbers<[1], [0], [0], [1], [0, 0, 1, 1], [], []>} : vector<8x32xf32>, vector<32x32xf32>, vector<8x32xf32> -> vector<8x32xf32>
    %c0_9 = arith.constant 0 : index
    %c0_10 = arith.constant 0 : index
    %10 = vector.load %arg7[%c0_9, %c0_10] : memref<1x32xf32, #tpu.memory_space<vmem>>, vector<1x32xf32>
    %11 = vector.broadcast %10 : vector<1x32xf32> to vector<8x32xf32>
    %12 = arith.addf %9, %11 : vector<8x32xf32>
    %cst_11 = arith.constant 0.000000e+00 : f32
    %13 = vector.broadcast %cst_11 : f32 to vector<8x32xf32>
    %14 = arith.maximumf %12, %13 : vector<8x32xf32>
    %c0_12 = arith.constant 0 : index
    %c0_13 = arith.constant 0 : index
    %15 = vector.load %arg8[%c0_12, %c0_13] : memref<32x5xf32, #tpu.memory_space<vmem>>, vector<32x5xf32>
    %cst_14 = arith.constant dense<0.000000e+00> : vector<8x5xf32>
    %16 = tpu.matmul %14, %15, %cst_14 {dimension_numbers = #tpu.dot_dimension_numbers<[1], [0], [0], [1], [0, 0, 1, 1], [], []>} : vector<8x32xf32>, vector<32x5xf32>, vector<8x5xf32> -> vector<8x5xf32>
    %c0_15 = arith.constant 0 : index
    %c0_16 = arith.constant 0 : index
    %17 = vector.load %arg9[%c0_15, %c0_16] : memref<1x5xf32, #tpu.memory_space<vmem>>, vector<1x5xf32>
    %18 = vector.broadcast %17 : vector<1x5xf32> to vector<8x5xf32>
    %19 = arith.addf %16, %18 : vector<8x5xf32>
    %20 = math.tanh %19 : vector<8x5xf32>
    %c0_17 = arith.constant 0 : index
    %c0_18 = arith.constant 0 : index
    %21 = vector.load %arg3[%c0_17, %c0_18] : memref<8x5xf32, #tpu.memory_space<vmem>>, vector<8x5xf32>
    %c0_19 = arith.constant 0 : index
    %c0_20 = arith.constant 0 : index
    %22 = vector.load %arg10[%c0_19, %c0_20] : memref<1x5xf32, #tpu.memory_space<vmem>>, vector<1x5xf32>
    %23 = vector.broadcast %22 : vector<1x5xf32> to vector<8x5xf32>
    %24 = arith.mulf %23, %21 : vector<8x5xf32>
    %25 = arith.addf %20, %24 : vector<8x5xf32>
    %cst_21 = arith.constant 2.500000e+00 : f32
    %26 = vector.broadcast %cst_21 : f32 to vector<8x5xf32>
    %27 = arith.mulf %26, %25 : vector<8x5xf32>
    %c0_22 = arith.constant 0 : index
    %c0_23 = arith.constant 0 : index
    %28 = vector.load %arg11[%c0_22, %c0_23] : memref<8x5xf32, #tpu.memory_space<vmem>>, vector<8x5xf32>
    tpu.vector_store %arg11[%c0_22, %c0_23], %27 {strides = array<i32>} : memref<8x5xf32, #tpu.memory_space<vmem>>, vector<8x5xf32>,
    %29 = arith.mulf %21, %21 : vector<8x5xf32>
    %cst_24 = arith.constant dense<0.000000e+00> : vector<8xf32>
    %30 = vector.multi_reduction <add>, %29, %cst_24 [1] : vector<8x5xf32> to vector<8xf32>
    %31 = vector.shape_cast %30 : vector<8xf32> to vector<8x1xf32>
    %cst_25 = arith.constant -5.000000e-01 : f32
    %32 = vector.broadcast %cst_25 : f32 to vector<8x1xf32>
    %33 = arith.mulf %32, %31 : vector<8x1xf32>
    %c0_26 = arith.constant 0 : index
    %c0_27 = arith.constant 0 : index
    %34 = memref.load %arg1[%c0_26, %c0_27] : memref<1x1xf32, #tpu.memory_space<smem>>
    %35 = vector.broadcast %34 : f32 to vector<8x1xf32>
    %36 = arith.addf %33, %35 : vector<8x1xf32>
    %c0_28 = arith.constant 0 : index
    %c0_29 = arith.constant 0 : index
    %37 = vector.load %arg12[%c0_28, %c0_29] : memref<8x1xf32, #tpu.memory_space<vmem>>, vector<8x1xf32>
    tpu.vector_store %arg12[%c0_28, %c0_29], %36 {strides = array<i32>} : memref<8x1xf32, #tpu.memory_space<vmem>>, vector<8x1xf32>,
    return
  }
  func.func @transform_0(%arg0: i32) -> (i32, i32) {
    %c0_i32 = arith.constant 0 : i32
    %c0_i32_0 = arith.constant 0 : i32
    %c0_i32_1 = arith.constant 0 : i32
    return %c0_i32, %c0_i32_0 : i32, i32
  }
  func.func @transform_1(%arg0: i32) -> (i32, i32) {
    %c0_i32 = arith.constant 0 : i32
    %c0_i32_0 = arith.constant 0 : i32
    return %arg0, %c0_i32 : i32, i32
  }
  func.func @transform_2(%arg0: i32) -> (i32, i32) {
    %c0_i32 = arith.constant 0 : i32
    %c0_i32_0 = arith.constant 0 : i32
    return %arg0, %c0_i32 : i32, i32
  }
  func.func @transform_3(%arg0: i32) -> (i32, i32) {
    %c0_i32 = arith.constant 0 : i32
    %c0_i32_0 = arith.constant 0 : i32
    %c0_i32_1 = arith.constant 0 : i32
    return %c0_i32, %c0_i32_0 : i32, i32
  }
  func.func @transform_4(%arg0: i32) -> (i32, i32) {
    %c0_i32 = arith.constant 0 : i32
    %c0_i32_0 = arith.constant 0 : i32
    %c0_i32_1 = arith.constant 0 : i32
    return %c0_i32, %c0_i32_0 : i32, i32
  }
  func.func @transform_5(%arg0: i32) -> (i32, i32) {
    %c0_i32 = arith.constant 0 : i32
    %c0_i32_0 = arith.constant 0 : i32
    %c0_i32_1 = arith.constant 0 : i32
    return %c0_i32, %c0_i32_0 : i32, i32
  }
  func.func @transform_6(%arg0: i32) -> (i32, i32) {
    %c0_i32 = arith.constant 0 : i32
    %c0_i32_0 = arith.constant 0 : i32
    %c0_i32_1 = arith.constant 0 : i32
    return %c0_i32, %c0_i32_0 : i32, i32
  }
  func.func @transform_7(%arg0: i32) -> (i32, i32) {
    %c0_i32 = arith.constant 0 : i32
    %c0_i32_0 = arith.constant 0 : i32
    %c0_i32_1 = arith.constant 0 : i32
    return %c0_i32, %c0_i32_0 : i32, i32
  }
  func.func @transform_8(%arg0: i32) -> (i32, i32) {
    %c0_i32 = arith.constant 0 : i32
    %c0_i32_0 = arith.constant 0 : i32
    %c0_i32_1 = arith.constant 0 : i32
    return %c0_i32, %c0_i32_0 : i32, i32
  }
  func.func @transform_9(%arg0: i32) -> (i32, i32) {
    %c0_i32 = arith.constant 0 : i32
    %c0_i32_0 = arith.constant 0 : i32
    %c0_i32_1 = arith.constant 0 : i32
    return %c0_i32, %c0_i32_0 : i32, i32
  }
  func.func @transform_10(%arg0: i32) -> (i32, i32) {
    %c0_i32 = arith.constant 0 : i32
    %c0_i32_0 = arith.constant 0 : i32
    return %arg0, %c0_i32 : i32, i32
  }
  func.func @transform_11(%arg0: i32) -> (i32, i32) {
    %c0_i32 = arith.constant 0 : i32
    %c0_i32_0 = arith.constant 0 : i32
    return %arg0, %c0_i32 : i32, i32
  }
}

</mosaic_0001>

<bundles_post_ra>
// kernel: tpu_custom_call.1
= control target key start
LH: loop header
LB: loop body
LE: loop exit
PB: predicated region body
PF: predicated region fallthrough
CT: control target
= control target key end

     0   :  { %18 = vsyncpa [#allocation4], 0  ;;  %s671_s0 = inlined_call_operand.<no memory space> [shape: f32[1,1], index: 0, kind: input, shape index: {}]   ;;  %s672_s1 = inlined_call_operand.hbm [shape: f32[6,12], index: 1, kind: input, shape index: {}]   ;;  %s673_s2 = inlined_call_operand.hbm [shape: f32[6,5], index: 2, kind: input, shape index: {}]   ;;  %s674_s3 = inlined_call_operand.vmem [shape: f32[12,32], index: 3, kind: input, shape index: {}]   ;;  %s675_s4 = inlined_call_operand.vmem [shape: f32[1,32], index: 4, kind: input, shape index: {}]   ;;  %s676_s5 = inlined_call_operand.vmem [shape: f32[32,32], index: 5, kind: input, shape index: {}]   ;;  %s677_s6 = inlined_call_operand.vmem [shape: f32[1,32], index: 6, kind: input, shape index: {}]   ;;  %s678_s7 = inlined_call_operand.vmem [shape: f32[32,5], index: 7, kind: input, shape index: {}]   ;;  %s679_s8 = inlined_call_operand.vmem [shape: f32[1,5], index: 8, kind: input, shape index: {}]   ;;  %s680_s9 = inlined_call_operand.vmem [shape: f32[1,5], index: 9, kind: input, shape index: {}]   ;;  %s681_s10 = inlined_call_operand.hbm [shape: f32[6,5], index: 10, kind: output, shape index: {0}]   ;;  %s682_s11 = inlined_call_operand.vmem [shape: f32[6,1], index: 11, kind: output, shape index: {1}]  }
   0x1   :  { %19 = vsyncpa [#allocation7], 0 }
   0x2   :  { %20 = vsyncpa [#allocation5], 0  ;;  %s513_s17 = smov [#allocation3]   ;;  %s514_s19 = smov [#allocation6]  }
   0x3   :  { %s29_s18 = sshll.u32 %s513_s17, 4  ;;  %s39_s20 = sshll.u32 %s514_s19, 4  ;;  %s30_s18 = int_to_ptr.vmem [resolvable:$true] %s29_s18  ;;  %s40_s20 = int_to_ptr.vmem [resolvable:$true] %s39_s20 }
   0x4   :  { %s441_s23 = scalar_lea.hbm %s672_s1, 128 }
   0x5   :  { %p442_p0 = scmp.ne.s32.totalorder %s672_s1, %s441_s23  ;;  %p445_p1 = scmp.lt.u32.totalorder %s441_s23, %s672_s1 }
   0x7   :  { %p447_p2 = pnand %p445_p1, %p442_p0 }
   0x9   :  { %450 = shalt.err (!%p447_p2)
}
   0xa   :  { %s451_s28 = scalar_lea.vmem %s30_s18, 128  ;;  %p456_p4 = scmp.lt.s32.totalorder %s30_s18, %s30_s18 }
   0xb   :  { %p452_p3 = scmp.ne.s32.totalorder %s30_s18, %s451_s28  ;;  %p457_p5 = scmp.lt.s32.totalorder %s451_s28, %s451_s28 }
   0xd   :  { %p458_p6 = por %p457_p5, %p456_p4 }
   0xf   :  { %p459_p7 = pnand %p458_p6, %p452_p3 }
  0x11   :  { %462 = shalt.err (!%p459_p7)
}
  0x12   :  { %32 = dma.hbm_to_vmem [thread:$0]  %s672_s1, 128, %s30_s18, [#allocation4]  }
  0x13   :  { %s463_s14 = scalar_lea.hbm %s673_s2, 128 }
  0x14   :  { %p464_p8 = scmp.ne.s32.totalorder %s673_s2, %s463_s14  ;;  %p467_p9 = scmp.lt.u32.totalorder %s463_s14, %s673_s2 }
  0x16   :  { %p469_p10 = pnand %p467_p9, %p464_p8 }
  0x18   :  { %472 = shalt.err (!%p469_p10)
}
  0x19   :  { %s473_s21 = scalar_lea.vmem %s40_s20, 128  ;;  %p478_p12 = scmp.lt.s32.totalorder %s40_s20, %s40_s20 }
  0x1a   :  { %p474_p11 = scmp.ne.s32.totalorder %s40_s20, %s473_s21  ;;  %p479_p13 = scmp.lt.s32.totalorder %s473_s21, %s473_s21 }
  0x1c   :  { %p480_p0 = por %p479_p13, %p478_p12 }
  0x1e   :  { %p481_p1 = pnand %p480_p0, %p474_p11 }
  0x20   :  { %484 = shalt.err (!%p481_p1)
}
  0x21   :  { %42 = dma.hbm_to_vmem [thread:$0]  %s673_s2, 128, %s40_s20, [#allocation7]  }
  0x22   :  { %507 = dma.done.wait [#allocation4], 128  }
  0x23   :  { %508 = vsyncadd [#allocation4], 4294967168 }
  0x24   :  { %509 = dma.done.wait [#allocation7], 128  }
  0x25   :  { %510 = vsyncadd [#allocation7], 4294967168  ;;  %v515_v0 = vmov 0.0|0.0   ;;  %vm516_vm0 = vmmov 0   ;;  %v517_v1 = vmov 0.0   ;;  %vm77_vm1 = vcmask 1043456  }
  0x26   :  { %416 = vmatprep.subr.bf16.mxu0 %v515_v0  ;;  %420 = vmatprep.subr.bf16.mxu1 %v515_v0  ;;  %v64_v2 = vld [vmem:[%s674_s3] sm:$0xff]  ;;  %v65_v3 = vld [vmem:[%s674_s3 + $0x8] sm:$0xf]  ;;  %vm518_vm2 = vmmov 1   ;;  %vm73_vm4 = vcmask 97280   ;;  %v154_v9 = vld [vmem:[%s676_s5 + $0x10] sm:$0xff]  ;;  %v342_v32 = vstv %s671_s0 }
  0x27   :  { %391 = vmatprep.mubr.msk.f32.mxu0 %vm516_vm0, %v517_v1  ;;  %402 = vmatprep.mubr.msk.f32.mxu1 %vm516_vm0, %v517_v1  ;;  %vm418_vm3 = vmpackc.low %vm77_vm1, %vm518_vm2  ;;  %v417_v4 = vpack.c.bf16 %v65_v3, %v64_v2  ;;  %v152_v5 = vld [vmem:[%s676_s5] sm:$0xff]  ;;  %v153_v6 = vld [vmem:[%s676_s5 + $0x8] sm:$0xff]  ;;  %vm163_vm5 = vcmask 261120   ;;  %vm334_vm6 = vcmask 39936   ;;  %vm344_vm7 = vcmask 7168   ;;  %s519_s0 = smov [#allocation8]  }
  0x28   :  { %v421_v7 = vpack.c.bf16 %v153_v6, %v152_v5  ;;  %v63_v8 = vld [vmem:[#allocation3] sm:$0xff]  ;;  %v155_v10 = vld [vmem:[%s676_s5 + $0x18] sm:$0xff]  ;;  %v239_v13 = vld [vmem:[%s678_s7 + $0x8] sm:$0xff]  ;;  %s352_s26 = sshll.u32 %s519_s0, 4  ;;  %s353_s26 = int_to_ptr.vmem [resolvable:$true] %s352_s26 }
  0x29   :  { %419 = vmatpush3.bf16.msk.msra.mxu0 %vm418_vm3, %v417_v4  ;;  %v424_v11 = vpack.c.bf16 %v155_v10, %v154_v9  ;;  %v238_v12 = vld [vmem:[%s678_s7] sm:$0xff]  ;;  %v240_v20 = vld [vmem:[%s678_s7 + $0x10] sm:$0xff]  ;;  %v241_v21 = vld [vmem:[%s678_s7 + $0x18] sm:$0xff]  ;;  %p490_p3 = scmp.lt.s32.totalorder %s353_s26, %s353_s26 }
  0x2a   :  { %422 = vmatpush3.bf16.msra.mxu1 %v421_v7  ;;  %426 = vmatprep.subr.bf16.mxu0 %v515_v0  ;;  %v427_v14 = vpack.c.bf16 %v239_v13, %v238_v12  ;;  %v366_v15 = vld [vmem:[%s675_s4] ss:$0 sm:$0xff]  ;;  %v430_v22 = vpack.c.bf16 %v241_v21, %v240_v20  ;;  %v323_v23 = vld [vmem:[#allocation6] sm:$0xff] }
  0x2b   :  { %423 = vmatprep.subr.bf16.mxu1 %v515_v0  ;;  %v336_v24 = vmul.f32 %v323_v23, %v323_v23  ;;  %v369_v26 = vld [vmem:[%s677_s6] ss:$0 sm:$0xff] }
  0x2c   :  { %392 = vmatmul.mubr.msk.f32.vlgmr.msra.gmra.mrb[0].mxu0 %vm73_vm4, %v63_v8  ;;  %v371_v35 = vld [vmem:[%s679_s8] ss:$0 sm:$0xff] }
  0x2d   :  { %413 = vmatprep.mubr.msk.f32.mxu0 %vm516_vm0, %v517_v1  ;;  %428 = vmatpush3.bf16.msra.mxu0 %v427_v14  ;;  %v337_v25 = vsel %vm334_vm6, %v336_v24, 0.0  ;;  %v373_v39 = vld [vmem:[%s680_s9] ss:$0 sm:$0xff] }
  0x2e   :  { %425 = vmatpush3.bf16.msra.mxu1 %v424_v11  ;;  %429 = vmatprep.subr.bf16.mxu0 %v515_v0  ;;  %v331_v40 = vmul.f32 %v373_v39, %v323_v23 }
  0x2f   :  { %338 = vadd.xlane.f32.xlu0 %v337_v25 }
  0x31   :  { %431 = vmatpush3.bf16.msra.mxu0 %v430_v22 }
  0xbc   :  { %v339_v31 = vpop.xlane.xlu0 %338 }
  0xbd   :  { %v340_v33 = vmul.f32 -0.5, %v339_v31 }
  0xbf   :  { %v343_v34 = vadd.f32 %v342_v32, %v340_v33 }
  0xc1   :  { %345 = vst.msk [vmem:[%s682_s11] sm:$0xff] %vm344_vm7, %v343_v34  ;;  %s485_s11 = scalar_lea.vmem %s353_s26, 128 }
  0xc2   :  { %p486_p2 = scmp.ne.s32.totalorder %s353_s26, %s485_s11  ;;  %p491_p4 = scmp.lt.s32.totalorder %s485_s11, %s485_s11 }
  0xc4   :  { %p492_p5 = por %p491_p4, %p490_p3 }
  0xc6   :  { %p493_p6 = pnand %p492_p5, %p486_p2 }
  0xff   :  { %v147_v16 = vpop.f32.mrb[0].mxu0 }
 0x100   :  { %v148_v17 = vadd.f32 %v366_v15, %v147_v16  ;;  %v393_v18 = vpop.f32.mrb[1].mxu0 }
 0x102   :  { %v151_v19 = vmax.f32 %v148_v17, 0.0 }
 0x104   :  { %403 = vmatmul.mubr.msk.f32.vlgmr.msra.gmra.mrb[0].mxu1 %vm163_vm5, %v151_v19 }
 0x1d7   :  { %v233_v27 = vpop.f32.mrb[0].mxu1 }
 0x1d8   :  { %v234_v28 = vadd.f32 %v369_v26, %v233_v27  ;;  %v404_v29 = vpop.f32.mrb[1].mxu1 }
 0x1da   :  { %v237_v30 = vmax.f32 %v234_v28, 0.0 }
 0x1dc   :  { %414 = vmatmul.mubr.msk.f32.vlgmr.msra.gmra.mrb[2].mxu0 %vm163_vm5, %v237_v30 }
 0x2af   :  { %v318_v36 = vpop.f32.mrb[2].mxu0 }
 0x2b0   :  { %v319_v37 = vadd.f32 %v371_v35, %v318_v36  ;;  %v415_v38 = vpop.f32.mrb[3].mxu0 }
 0x2b2   :  { %439 = vtanh.f32 %v319_v37 }
 0x2bc   :  { %v440_v41 = vpop.eup %439 }
 0x2bd   :  { %v332_v42 = vadd.f32 %v440_v41, %v331_v40 }
 0x2bf   :  { %v333_v43 = vmul.f32 2.5, %v332_v42 }
 0x2c1   :  { %335 = vst.msk [vmem:[#allocation8] sm:$0xff] %vm334_vm6, %v333_v43 }
 0x2c2   :  { %496 = shalt.err (!%p493_p6)
}
 0x2c3   :  { %s497_s9 = scalar_lea.hbm %s681_s10, 128 }
 0x2c4   :  { %p498_p7 = scmp.ne.s32.totalorder %s681_s10, %s497_s9  ;;  %p501_p8 = scmp.lt.u32.totalorder %s497_s9, %s681_s10 }
 0x2c6   :  { %p503_p9 = pnand %p501_p8, %p498_p7 }
 0x2c8   :  { %506 = shalt.err (!%p503_p9)
}
 0x2c9   :  { %355 = dma.vmem_to_hbm [thread:$0]  %s353_s26, 128, %s681_s10, [#allocation5]  }
 0x2ca   :  { %511 = dma.done.wait [#allocation5], 128  }
 0x2cb   :  { %512 = vsyncadd [#allocation5], 4294967168 }
 0x2cc   :  { %363 = vsyncpa [#allocation4], 1 }
 0x2cd   :  { %364 = vsyncpa [#allocation7], 1 }
 0x2ce   :  { %365 = vsyncpa [#allocation5], 1 }

</bundles_post_ra>
